<compile_context>
chip_gen: v7x
topology: tpu7x:2x2x1
jax: 0.10.0
libtpu: 0.0.40
codegen_flags: <defaults>
</compile_context>

<pallas_src>
import functools

import numpy as np
import jax
import jax.numpy as jnp
from jax import lax
from jax.experimental import pallas as pl
from jax.experimental.pallas import tpu as pltpu


# ----------------------------------------------------------------------------
# Lagrange-basis constants (pure numpy, evaluated at trace time)
# ----------------------------------------------------------------------------
def _lagrange_consts(n_order):
    """Reference nodes and the constant D_j = prod_{m != j} 1/(x_j - x_m)."""
    n = n_order + 1
    nodes = np.linspace(-1.0, 1.0, n).astype(np.float64)
    inv_d = []
    for j in range(n):
        d = 1.0
        for m in range(n):
            if m != j:
                d *= 1.0 / (nodes[j] - nodes[m])
        inv_d.append(float(d))
    return [float(v) for v in nodes], inv_d


def _local_basis(x_t, n_order, dscale, ddscale):
    """phi / dphi / ddphi local Lagrange bases on the reference element [-1,1].

    All constant denominators AND the 1/delta_x, 1/delta_x**2 chain-rule
    factors are folded into a single numpy constant per basis function
    (multiplies only, no in-kernel divisions, no per-node rescaling); the
    (x - node_m) differences are hoisted and reused."""
    n = n_order + 1
    nodes, inv_d = _lagrange_consts(n_order)
    diffs = [x_t - nodes[m] for m in range(n)]

    phi, dphi, ddphi = [], [], []
    for j in range(n):
        cj = inv_d[j]

        # phi_j = D_j * prod_{m != j} (x - x_m)
        p = None
        for m in range(n):
            if m != j:
                p = diffs[m] if p is None else p * diffs[m]
        if p is None:
            p = jnp.ones_like(x_t)
        phi.append(p * cj)

        # dphi_j = D_j * sum_{i != j} prod_{m != i,j} (x - x_m)
        s1 = None
        for i in range(n):
            if i == j:
                continue
            t = None
            for m in range(n):
                if m != i and m != j:
                    t = diffs[m] if t is None else t * diffs[m]
            if t is None:
                t = jnp.ones_like(x_t)
            s1 = t if s1 is None else s1 + t
        if s1 is None:
            s1 = jnp.zeros_like(x_t)
        dphi.append(s1 * (cj * dscale))

        # ddphi_j = D_j * sum_{i != j} sum_{m != i,j} prod_{q != i,j,m} (x - x_q)
        s2 = None
        for i in range(n):
            if i == j:
                continue
            for m in range(n):
                if m == i or m == j:
                    continue
                t = None
                for q in range(n):
                    if q != i and q != j and q != m:
                        t = diffs[q] if t is None else t * diffs[q]
                if t is None:
                    t = jnp.ones_like(x_t)
                s2 = t if s2 is None else s2 + t
        if s2 is None:
            s2 = jnp.zeros_like(x_t)
        ddphi.append(s2 * (cj * ddscale))
    return phi, dphi, ddphi


def _dense_stacked_basis(x, *, n_order, n_elements, n_nodes, x_min, x_max):
    """x: (1, T) f32, samples on lanes.  Returns the stacked dense basis
    (3*n_nodes, T) f32 = [phi ; dphi/dx ; ddphi/dx^2] with the node axis on
    sublanes and samples on lanes."""
    T = x.shape[-1]
    P = n_nodes
    shift_scale = float((n_nodes - 1) / (x_max - x_min))
    inv_order = float(1.0 / n_order)
    x_shift = (x - float(x_min)) * shift_scale
    id_elem = jnp.clip(jnp.floor(x_shift * inv_order), 0.0,
                       float(n_elements - 1))
    nodes_l = id_elem * float(n_order)
    x_t = (x_shift - nodes_l) * float(2.0 / n_order) - 1.0

    delta_x = 0.5 * n_order * (x_max - x_min) / (n_nodes - 1)
    phi_l, dphi_l, ddphi_l = _local_basis(
        x_t, n_order, dscale=1.0 / delta_x, ddscale=1.0 / (delta_x * delta_x))

    # Dense scatter: row p of the dense basis holds the local value for node
    # (p - nodes_l) when 0 <= p - nodes_l <= n_order, else 0.  Each dense row
    # is hit by at most one local node per column (distinct node offsets per
    # element), so the nested select chain is exactly the reference scatter.
    p_iota = lax.broadcasted_iota(jnp.int32, (P, T), 0)
    local = p_iota - nodes_l.astype(jnp.int32)                # (P, T)
    masks = [local == node for node in range(n_order + 1)]    # shared masks

    def scatter(vals):
        acc = jnp.where(masks[n_order], vals[n_order], 0.0)
        for node in range(n_order - 1, -1, -1):
            acc = jnp.where(masks[node], vals[node], acc)
        return acc

    return jnp.concatenate(
        [scatter(phi_l), scatter(dphi_l), scatter(ddphi_l)], axis=0)   # (3P, T)


# ----------------------------------------------------------------------------
# Pallas kernels
# ----------------------------------------------------------------------------
def _kann_kernel_shared_x(x_ref, wdiag_ref, phi_ref, t_ref, *, n_order,
                          n_elements, n_nodes, x_min, x_max):
    """Fast path: 1-D input repeated over width -> the basis is width
    independent; the node contraction for all three derivatives runs as one
    block-diagonal MXU matmul (3W, 3P) @ (3P, T)."""
    big = _dense_stacked_basis(
        x_ref[...], n_order=n_order, n_elements=n_elements, n_nodes=n_nodes,
        x_min=x_min, x_max=x_max)
    phi_ref[...] = big
    t_ref[...] = jnp.dot(wdiag_ref[...], big,
                         preferred_element_type=jnp.float32)


def _kann_kernel_general(x_ref, wrow_ref, phi_ref, t_ref, *, n_order,
                         n_elements, n_nodes, x_min, x_max):
    """General path: already-2-D input.  The grid is (width, sample tiles);
    this step handles one width row.  wrow_ref holds the (3, 3P)
    block-diagonal expansion of that row's weight, so one small matmul
    produces t, dt and ddt."""
    big = _dense_stacked_basis(
        x_ref[0], n_order=n_order, n_elements=n_elements, n_nodes=n_nodes,
        x_min=x_min, x_max=x_max)
    phi_ref[0] = big
    t_ref[0] = jnp.dot(wrow_ref[0], big, preferred_element_type=jnp.float32)


# ----------------------------------------------------------------------------
# Wrapper
# ----------------------------------------------------------------------------
_MAX_LANE_TILE = 8192


def _round_up(a, b):
    return pl.cdiv(a, b) * b


def lagrange_kann_forward(x, weight, *, n_width, n_order, n_elements,
                          n_samples, x_min, x_max):
    n_nodes = n_elements * n_order + 1
    P, W, S = n_nodes, n_width, n_samples
    weight = jnp.asarray(weight, jnp.float32)
    x = jnp.asarray(x, jnp.float32)
    delta_x = 0.5 * n_order * (float(x_max) - float(x_min)) / (n_nodes - 1)

    shared_x = (x.ndim != 2)          # module repeats a 1-D x across width

    # samples live on the 128-wide lane axis; tile the sample axis
    lanes = _round_up(S, 128)
    tile = min(_MAX_LANE_TILE, lanes)
    if lanes >= 256 and lanes // tile < 2:
        # at least two grid steps so the 'parallel' axis can shard on v7x's 2 TCs
        tile = _round_up(pl.cdiv(lanes, 2), 128)
    n_pad = _round_up(S, tile)
    n_tiles = n_pad // tile

    static = dict(n_order=n_order, n_elements=n_elements, n_nodes=P,
                  x_min=float(x_min), x_max=float(x_max))

    if shared_x:
        # pad with x_min (in-range) -> padded lanes produce valid, sliced-off values
        x_row = jnp.pad(x.reshape(1, S), ((0, 0), (0, n_pad - S)),
                        constant_values=float(x_min))
        # block-diagonal weight: one MXU matmul covers phi/dphi/ddphi at once
        zW = jnp.zeros((W, P), jnp.float32)
        wdiag = jnp.concatenate(
            [jnp.concatenate([weight, zW, zW], axis=1),
             jnp.concatenate([zW, weight, zW], axis=1),
             jnp.concatenate([zW, zW, weight], axis=1)], axis=0)   # (3W, 3P)
        kernel = functools.partial(_kann_kernel_shared_x, **static)
        out_shape = (jax.ShapeDtypeStruct((3 * P, n_pad), jnp.float32),
                     jax.ShapeDtypeStruct((3 * W, n_pad), jnp.float32))
        grid = (n_tiles,)
        in_specs = [pl.BlockSpec((1, tile), lambda i: (0, i)),
                    pl.BlockSpec((3 * W, 3 * P), lambda i: (0, 0))]
        out_specs = (pl.BlockSpec((3 * P, tile), lambda i: (0, i)),
                     pl.BlockSpec((3 * W, tile), lambda i: (0, i)))
        operands = (x_row, wdiag)
        dims = ("parallel",)
        flops = 2 * (3 * W) * (3 * P) * n_pad + 250 * P * n_pad
        bytes_acc = 4 * (n_pad * (1 + 3 * P + 3 * W) + 9 * W * P)
    else:
        assert x.shape == (S, W)
        x_gen = jnp.pad(x.T.reshape(W, 1, S), ((0, 0), (0, 0), (0, n_pad - S)),
                        constant_values=float(x_min))
        # per-row block-diagonal weight (W, 3, 3P); no width-tiled weight in HBM
        wrows = jnp.einsum('bc,kp->kbcp', jnp.eye(3, dtype=jnp.float32),
                           weight).reshape(W, 3, 3 * P)
        kernel = functools.partial(_kann_kernel_general, **static)
        out_shape = (jax.ShapeDtypeStruct((W, 3 * P, n_pad), jnp.float32),
                     jax.ShapeDtypeStruct((W, 3, n_pad), jnp.float32))
        grid = (W, n_tiles)
        in_specs = [pl.BlockSpec((1, 1, tile), lambda k, i: (k, 0, i)),
                    pl.BlockSpec((1, 3, 3 * P), lambda k, i: (k, 0, 0))]
        out_specs = (pl.BlockSpec((1, 3 * P, tile), lambda k, i: (k, 0, i)),
                     pl.BlockSpec((1, 3, tile), lambda k, i: (k, 0, i)))
        operands = (x_gen, wrows)
        dims = ("parallel", "parallel")
        flops = W * (2 * 3 * (3 * P) * n_pad + 250 * P * n_pad)
        bytes_acc = 4 * (W * n_pad * (1 + 3 * P + 3) + 9 * W * P)

    phi_all, t_all = pl.pallas_call(
        kernel,
        out_shape=out_shape,
        grid=grid,
        in_specs=in_specs,
        out_specs=out_specs,
        compiler_params=pltpu.CompilerParams(
            dimension_semantics=dims,
            vmem_limit_bytes=32 * 1024 * 1024),
        cost_estimate=pl.CostEstimate(flops=int(flops), transcendentals=0,
                                      bytes_accessed=int(bytes_acc)),
    )(*operands)

    if shared_x:
        phi_sp = phi_all[:, :S].reshape(3, P, S).transpose(0, 2, 1)   # (3, S, P)
        # module semantics require the width-repeated phi tensors as outputs
        phi_full = jnp.broadcast_to(phi_sp[:, :, None, :], (3, S, W, P))
        t_sw = t_all[:, :S].reshape(3, W, S).transpose(0, 2, 1)       # (3, S, W)
    else:
        phi_full = phi_all[:, :, :S].reshape(W, 3, P, S).transpose(1, 3, 0, 2)
        t_sw = t_all[:, :, :S].transpose(1, 2, 0)

    return {'t_ik': t_sw[0], 'dt_ik': t_sw[1], 'ddt_ik': t_sw[2],
            'phi_ikp': phi_full[0], 'dphi_ikp': phi_full[1],
            'ddphi_ikp': phi_full[2], 'delta_x': delta_x}


# ----------------------------------------------------------------------------
# Pure-JAX/numpy reference (faithful division-based transcription of torch)
# ----------------------------------------------------------------------------
def _reference(x, weight, *, n_width, n_order, n_elements, n_samples,
               x_min, x_max):
    n_nodes = n_elements * n_order + 1
    if x.ndim != 2:
        x = jnp.repeat(x[:, None], n_width, axis=-1)
    x = x.astype(jnp.float32)
    nodes = np.linspace(-1.0, 1.0, n_order + 1, dtype=np.float32)

    x_shift = (n_nodes - 1) * (x - x_min) / (x_max - x_min)
    id_elem = jnp.clip(jnp.floor(x_shift / n_order), 0.0, float(n_elements - 1))
    nodes_l = id_elem * n_order
    nodes_r = nodes_l + n_order
    x_t = 2.0 * (x_shift - nodes_l) / (nodes_r - nodes_l) - 1.0
    delta_x = 0.5 * n_order * (x_max - x_min) / (n_nodes - 1)

    def lag(xv):
        out = []
        for j in range(n_order + 1):
            p = jnp.ones_like(xv)
            for m in range(n_order + 1):
                if j != m:
                    p = p * (xv - nodes[m]) / (nodes[j] - nodes[m])
            out.append(p)
        return jnp.stack(out, -1)

    def dlag(xv):
        out = []
        for j in range(n_order + 1):
            y = jnp.zeros_like(xv)
            for i in range(n_order + 1):
                if i != j:
                    k = jnp.ones_like(xv) / (nodes[j] - nodes[i])
                    for m in range(n_order + 1):
                        if m != i and m != j:
                            k = k * (xv - nodes[m]) / (nodes[j] - nodes[m])
                    y = y + k
            out.append(y)
        return jnp.stack(out, -1)

    def ddlag(xv):
        out = []
        for j in range(n_order + 1):
            y = jnp.zeros_like(xv)
            for i in range(n_order + 1):
                if i != j:
                    ks = jnp.zeros_like(xv)
                    for m in range(n_order + 1):
                        if m != i and m != j:
                            kp = jnp.ones_like(xv) / (nodes[j] - nodes[m])
                            for q in range(n_order + 1):
                                if q != i and q != j and q != m:
                                    kp = kp * (xv - nodes[q]) / (nodes[j] - nodes[q])
                            ks = ks + kp
                    y = y + (1.0 / (nodes[j] - nodes[i])) * ks
            out.append(y)
        return jnp.stack(out, -1)

    phi_l, dphi_l, ddphi_l = lag(x_t), dlag(x_t), ddlag(x_t)
    p = jnp.arange(n_nodes)[None, None, :]
    li = nodes_l.astype(jnp.int32)[..., None]
    phi = jnp.zeros((n_samples, n_width, n_nodes), jnp.float32)
    dphi = jnp.zeros_like(phi)
    ddphi = jnp.zeros_like(phi)
    for node in range(n_order + 1):
        m = p == (li + node)
        phi = jnp.where(m, phi_l[..., node:node + 1], phi)
        dphi = jnp.where(m, dphi_l[..., node:node + 1] / delta_x, dphi)
        ddphi = jnp.where(m, ddphi_l[..., node:node + 1] / delta_x ** 2, ddphi)

    w64 = np.asarray(weight, np.float64)
    t = np.einsum('kp,ikp->ik', w64, np.asarray(phi, np.float64))
    dt = np.einsum('kp,ikp->ik', w64, np.asarray(dphi, np.float64))
    ddt = np.einsum('kp,ikp->ik', w64, np.asarray(ddphi, np.float64))
    return t, dt, ddt, phi, dphi, ddphi


if __name__ == "__main__":
    n_width, n_order, n_elements, n_samples = 4, 3, 5, 8
    n_nodes = n_elements * n_order + 1        # 16
    x_min, x_max = 0.0, 1.0

    key = jax.random.PRNGKey(0)
    kx1, kx2, kw = jax.random.split(key, 3)
    x1 = jax.random.uniform(kx1, (n_samples,), jnp.float32, x_min, x_max)
    x2 = jax.random.uniform(kx2, (n_samples, n_width), jnp.float32, x_min, x_max)
    weight = 0.1 * jax.random.normal(kw, (n_width, n_nodes), jnp.float32)

    hp = dict(n_width=n_width, n_order=n_order, n_elements=n_elements,
              n_samples=n_samples, x_min=x_min, x_max=x_max)

    def check(out, ref):
        t_r, dt_r, ddt_r, phi_r, dphi_r, ddphi_r = ref
        refs = dict(t_ik=t_r, dt_ik=dt_r, ddt_ik=ddt_r,
                    phi_ikp=phi_r, dphi_ikp=dphi_r, ddphi_ikp=ddphi_r)
        # phi tensors: pure f32 VPU math, tight tolerance.
        for name in ('phi_ikp', 'dphi_ikp', 'ddphi_ikp'):
            np.testing.assert_allclose(np.asarray(out[name]),
                                       np.asarray(refs[name]),
                                       rtol=1e-4, atol=1e-2)
        # t tensors: looser tolerance so the check is robust to the MXU's
        # matmul precision mode (ref contraction done in float64 numpy).
        for name in ('t_ik', 'dt_ik', 'ddt_ik'):
            r = np.asarray(refs[name], np.float64)
            tol = 1e-2 * max(1.0, float(np.abs(r).max()))
            np.testing.assert_allclose(np.asarray(out[name]), r,
                                       rtol=1e-2, atol=tol)

    # fast path: 1-D input (the module repeats it across the width dimension)
    out1 = lagrange_kann_forward(x1, weight, **hp)
    jax.block_until_ready(out1)
    check(out1, _reference(x1, weight, **hp))

    # general path: already-2-D input with distinct columns
    out2 = lagrange_kann_forward(x2, weight, **hp)
    jax.block_until_ready(out2)
    check(out2, _reference(x2, weight, **hp))

    print("KERNEL_OK")
</pallas_src>

<mosaic_0001>
module attributes {stable_mosaic.version = 11 : i64} {
  func.func @_kann_kernel_shared_x(%arg0: i32, %arg1: memref<1x128xf32, #tpu.memory_space<vmem>>, %arg2: memref<12x48xf32, #tpu.memory_space<vmem>>, %arg3: memref<48x128xf32, #tpu.memory_space<vmem>>, %arg4: memref<12x128xf32, #tpu.memory_space<vmem>>) attributes {dimension_semantics = [#tpu.dimension_semantics<parallel>], iteration_bounds = array<i64: 1>, scalar_prefetch = 0 : i64, scratch_operands = 0 : i64, tpu.core_type = #tpu.core_type<tc>, window_params = [{transform_indices = @transform_0, window_bounds = array<i64: 1, 128>}, {pipeline_mode = #tpu.pipeline_mode<synchronous>, transform_indices = @transform_1, window_bounds = array<i64: 12, 48>}, {transform_indices = @transform_2, window_bounds = array<i64: 48, 128>}, {transform_indices = @transform_3, window_bounds = array<i64: 12, 128>}]} {
    %c0 = arith.constant 0 : index
    %c0_0 = arith.constant 0 : index
    %0 = vector.load %arg1[%c0, %c0_0] : memref<1x128xf32, #tpu.memory_space<vmem>>, vector<1x128xf32>
    %cst = arith.constant 0.000000e+00 : f32
    %1 = vector.broadcast %cst : f32 to vector<1x128xf32>
    %2 = arith.subf %0, %1 : vector<1x128xf32>
    %cst_1 = arith.constant 1.500000e+01 : f32
    %3 = vector.broadcast %cst_1 : f32 to vector<1x128xf32>
    %4 = arith.mulf %2, %3 : vector<1x128xf32>
    %cst_2 = arith.constant 0.333333343 : f32
    %5 = vector.broadcast %cst_2 : f32 to vector<1x128xf32>
    %6 = arith.mulf %4, %5 : vector<1x128xf32>
    %7 = math.floor %6 : vector<1x128xf32>
    %cst_3 = arith.constant 0.000000e+00 : f32
    %cst_4 = arith.constant 4.000000e+00 : f32
    %8 = vector.broadcast %cst_3 : f32 to vector<1x128xf32>
    %9 = arith.maximumf %8, %7 : vector<1x128xf32>
    %10 = vector.broadcast %cst_4 : f32 to vector<1x128xf32>
    %11 = arith.minimumf %10, %9 : vector<1x128xf32>
    %cst_5 = arith.constant 3.000000e+00 : f32
    %12 = vector.broadcast %cst_5 : f32 to vector<1x128xf32>
    %13 = arith.mulf %11, %12 : vector<1x128xf32>
    %14 = arith.subf %4, %13 : vector<1x128xf32>
    %cst_6 = arith.constant 0.666666686 : f32
    %15 = vector.broadcast %cst_6 : f32 to vector<1x128xf32>
    %16 = arith.mulf %14, %15 : vector<1x128xf32>
    %cst_7 = arith.constant 1.000000e+00 : f32
    %17 = vector.broadcast %cst_7 : f32 to vector<1x128xf32>
    %18 = arith.subf %16, %17 : vector<1x128xf32>
    %cst_8 = arith.constant -1.000000e+00 : f32
    %19 = vector.broadcast %cst_8 : f32 to vector<1x128xf32>
    %20 = arith.subf %18, %19 : vector<1x128xf32>
    %cst_9 = arith.constant -0.333333343 : f32
    %21 = vector.broadcast %cst_9 : f32 to vector<1x128xf32>
    %22 = arith.subf %18, %21 : vector<1x128xf32>
    %cst_10 = arith.constant 0.333333343 : f32
    %23 = vector.broadcast %cst_10 : f32 to vector<1x128xf32>
    %24 = arith.subf %18, %23 : vector<1x128xf32>
    %cst_11 = arith.constant 1.000000e+00 : f32
    %25 = vector.broadcast %cst_11 : f32 to vector<1x128xf32>
    %26 = arith.subf %18, %25 : vector<1x128xf32>
    %27 = arith.mulf %22, %24 : vector<1x128xf32>
    %28 = arith.mulf %27, %26 : vector<1x128xf32>
    %cst_12 = arith.constant -5.625000e-01 : f32
    %29 = vector.broadcast %cst_12 : f32 to vector<1x128xf32>
    %30 = arith.mulf %28, %29 : vector<1x128xf32>
    %31 = arith.mulf %24, %26 : vector<1x128xf32>
    %32 = arith.mulf %22, %26 : vector<1x128xf32>
    %33 = arith.addf %31, %32 : vector<1x128xf32>
    %34 = arith.mulf %22, %24 : vector<1x128xf32>
    %35 = arith.addf %33, %34 : vector<1x128xf32>
    %cst_13 = arith.constant -5.625000e+00 : f32
    %36 = vector.broadcast %cst_13 : f32 to vector<1x128xf32>
    %37 = arith.mulf %35, %36 : vector<1x128xf32>
    %38 = arith.addf %26, %24 : vector<1x128xf32>
    %39 = arith.addf %38, %26 : vector<1x128xf32>
    %40 = arith.addf %39, %22 : vector<1x128xf32>
    %41 = arith.addf %40, %24 : vector<1x128xf32>
    %42 = arith.addf %41, %22 : vector<1x128xf32>
    %cst_14 = arith.constant -5.625000e+01 : f32
    %43 = vector.broadcast %cst_14 : f32 to vector<1x128xf32>
    %44 = arith.mulf %42, %43 : vector<1x128xf32>
    %45 = arith.mulf %20, %24 : vector<1x128xf32>
    %46 = arith.mulf %45, %26 : vector<1x128xf32>
    %cst_15 = arith.constant 1.687500e+00 : f32
    %47 = vector.broadcast %cst_15 : f32 to vector<1x128xf32>
    %48 = arith.mulf %46, %47 : vector<1x128xf32>
    %49 = arith.mulf %24, %26 : vector<1x128xf32>
    %50 = arith.mulf %20, %26 : vector<1x128xf32>
    %51 = arith.addf %49, %50 : vector<1x128xf32>
    %52 = arith.mulf %20, %24 : vector<1x128xf32>
    %53 = arith.addf %51, %52 : vector<1x128xf32>
    %cst_16 = arith.constant 1.687500e+01 : f32
    %54 = vector.broadcast %cst_16 : f32 to vector<1x128xf32>
    %55 = arith.mulf %53, %54 : vector<1x128xf32>
    %56 = arith.addf %26, %24 : vector<1x128xf32>
    %57 = arith.addf %56, %26 : vector<1x128xf32>
    %58 = arith.addf %57, %20 : vector<1x128xf32>
    %59 = arith.addf %58, %24 : vector<1x128xf32>
    %60 = arith.addf %59, %20 : vector<1x128xf32>
    %cst_17 = arith.constant 1.687500e+02 : f32
    %61 = vector.broadcast %cst_17 : f32 to vector<1x128xf32>
    %62 = arith.mulf %60, %61 : vector<1x128xf32>
    %63 = arith.mulf %20, %22 : vector<1x128xf32>
    %64 = arith.mulf %63, %26 : vector<1x128xf32>
    %cst_18 = arith.constant -1.687500e+00 : f32
    %65 = vector.broadcast %cst_18 : f32 to vector<1x128xf32>
    %66 = arith.mulf %64, %65 : vector<1x128xf32>
    %67 = arith.mulf %22, %26 : vector<1x128xf32>
    %68 = arith.mulf %20, %26 : vector<1x128xf32>
    %69 = arith.addf %67, %68 : vector<1x128xf32>
    %70 = arith.mulf %20, %22 : vector<1x128xf32>
    %71 = arith.addf %69, %70 : vector<1x128xf32>
    %cst_19 = arith.constant -1.687500e+01 : f32
    %72 = vector.broadcast %cst_19 : f32 to vector<1x128xf32>
    %73 = arith.mulf %71, %72 : vector<1x128xf32>
    %74 = arith.addf %26, %22 : vector<1x128xf32>
    %75 = arith.addf %74, %26 : vector<1x128xf32>
    %76 = arith.addf %75, %20 : vector<1x128xf32>
    %77 = arith.addf %76, %22 : vector<1x128xf32>
    %78 = arith.addf %77, %20 : vector<1x128xf32>
    %cst_20 = arith.constant -1.687500e+02 : f32
    %79 = vector.broadcast %cst_20 : f32 to vector<1x128xf32>
    %80 = arith.mulf %78, %79 : vector<1x128xf32>
    %81 = arith.mulf %20, %22 : vector<1x128xf32>
    %82 = arith.mulf %81, %24 : vector<1x128xf32>
    %cst_21 = arith.constant 5.625000e-01 : f32
    %83 = vector.broadcast %cst_21 : f32 to vector<1x128xf32>
    %84 = arith.mulf %82, %83 : vector<1x128xf32>
    %85 = arith.mulf %22, %24 : vector<1x128xf32>
    %86 = arith.mulf %20, %24 : vector<1x128xf32>
    %87 = arith.addf %85, %86 : vector<1x128xf32>
    %88 = arith.mulf %20, %22 : vector<1x128xf32>
    %89 = arith.addf %87, %88 : vector<1x128xf32>
    %cst_22 = arith.constant 5.625000e+00 : f32
    %90 = vector.broadcast %cst_22 : f32 to vector<1x128xf32>
    %91 = arith.mulf %89, %90 : vector<1x128xf32>
    %92 = arith.addf %24, %22 : vector<1x128xf32>
    %93 = arith.addf %92, %24 : vector<1x128xf32>
    %94 = arith.addf %93, %20 : vector<1x128xf32>
    %95 = arith.addf %94, %22 : vector<1x128xf32>
    %96 = arith.addf %95, %20 : vector<1x128xf32>
    %cst_23 = arith.constant 5.625000e+01 : f32
    %97 = vector.broadcast %cst_23 : f32 to vector<1x128xf32>
    %98 = arith.mulf %96, %97 : vector<1x128xf32>
    %99 = tpu.iota {dimensions = array<i32: 0>} : vector<16x128xi32>
    %100 = arith.fptosi %13 : vector<1x128xf32> to vector<1x128xi32>
    %101 = vector.broadcast %100 : vector<1x128xi32> to vector<16x128xi32>
    %102 = arith.subi %99, %101 : vector<16x128xi32>
    %c0_i32 = arith.constant 0 : i32
    %103 = vector.broadcast %c0_i32 : i32 to vector<16x128xi32>
    %104 = arith.cmpi eq, %102, %103 : vector<16x128xi32>
    %c1_i32 = arith.constant 1 : i32
    %105 = vector.broadcast %c1_i32 : i32 to vector<16x128xi32>
    %106 = arith.cmpi eq, %102, %105 : vector<16x128xi32>
    %c2_i32 = arith.constant 2 : i32
    %107 = vector.broadcast %c2_i32 : i32 to vector<16x128xi32>
    %108 = arith.cmpi eq, %102, %107 : vector<16x128xi32>
    %c3_i32 = arith.constant 3 : i32
    %109 = vector.broadcast %c3_i32 : i32 to vector<16x128xi32>
    %110 = arith.cmpi eq, %102, %109 : vector<16x128xi32>
    %cst_24 = arith.constant 0.000000e+00 : f32
    %111 = vector.shape_cast %84 : vector<1x128xf32> to vector<1x128xf32>
    %112 = vector.broadcast %111 : vector<1x128xf32> to vector<16x128xf32>
    %113 = vector.broadcast %cst_24 : f32 to vector<16x128xf32>
    %114 = arith.select %110, %112, %113 : vector<16x128xi1>, vector<16x128xf32>
    %115 = vector.shape_cast %66 : vector<1x128xf32> to vector<1x128xf32>
    %116 = vector.broadcast %115 : vector<1x128xf32> to vector<16x128xf32>
    %117 = arith.select %108, %116, %114 : vector<16x128xi1>, vector<16x128xf32>
    %118 = vector.shape_cast %48 : vector<1x128xf32> to vector<1x128xf32>
    %119 = vector.broadcast %118 : vector<1x128xf32> to vector<16x128xf32>
    %120 = arith.select %106, %119, %117 : vector<16x128xi1>, vector<16x128xf32>
    %121 = vector.shape_cast %30 : vector<1x128xf32> to vector<1x128xf32>
    %122 = vector.broadcast %121 : vector<1x128xf32> to vector<16x128xf32>
    %123 = arith.select %104, %122, %120 : vector<16x128xi1>, vector<16x128xf32>
    %cst_25 = arith.constant 0.000000e+00 : f32
    %124 = vector.shape_cast %91 : vector<1x128xf32> to vector<1x128xf32>
    %125 = vector.broadcast %124 : vector<1x128xf32> to vector<16x128xf32>
    %126 = vector.broadcast %cst_25 : f32 to vector<16x128xf32>
    %127 = arith.select %110, %125, %126 : vector<16x128xi1>, vector<16x128xf32>
    %128 = vector.shape_cast %73 : vector<1x128xf32> to vector<1x128xf32>
    %129 = vector.broadcast %128 : vector<1x128xf32> to vector<16x128xf32>
    %130 = arith.select %108, %129, %127 : vector<16x128xi1>, vector<16x128xf32>
    %131 = vector.shape_cast %55 : vector<1x128xf32> to vector<1x128xf32>
    %132 = vector.broadcast %131 : vector<1x128xf32> to vector<16x128xf32>
    %133 = arith.select %106, %132, %130 : vector<16x128xi1>, vector<16x128xf32>
    %134 = vector.shape_cast %37 : vector<1x128xf32> to vector<1x128xf32>
    %135 = vector.broadcast %134 : vector<1x128xf32> to vector<16x128xf32>
    %136 = arith.select %104, %135, %133 : vector<16x128xi1>, vector<16x128xf32>
    %cst_26 = arith.constant 0.000000e+00 : f32
    %137 = vector.shape_cast %98 : vector<1x128xf32> to vector<1x128xf32>
    %138 = vector.broadcast %137 : vector<1x128xf32> to vector<16x128xf32>
    %139 = vector.broadcast %cst_26 : f32 to vector<16x128xf32>
    %140 = arith.select %110, %138, %139 : vector<16x128xi1>, vector<16x128xf32>
    %141 = vector.shape_cast %80 : vector<1x128xf32> to vector<1x128xf32>
    %142 = vector.broadcast %141 : vector<1x128xf32> to vector<16x128xf32>
    %143 = arith.select %108, %142, %140 : vector<16x128xi1>, vector<16x128xf32>
    %144 = vector.shape_cast %62 : vector<1x128xf32> to vector<1x128xf32>
    %145 = vector.broadcast %144 : vector<1x128xf32> to vector<16x128xf32>
    %146 = arith.select %106, %145, %143 : vector<16x128xi1>, vector<16x128xf32>
    %147 = vector.shape_cast %44 : vector<1x128xf32> to vector<1x128xf32>
    %148 = vector.broadcast %147 : vector<1x128xf32> to vector<16x128xf32>
    %149 = arith.select %104, %148, %146 : vector<16x128xi1>, vector<16x128xf32>
    %150 = tpu.concatenate %123, %136, %149 in 0 : vector<16x128xf32>, vector<16x128xf32>, vector<16x128xf32> -> vector<48x128xf32>
    %c0_27 = arith.constant 0 : index
    %c0_28 = arith.constant 0 : index
    %151 = vector.load %arg3[%c0_27, %c0_28] : memref<48x128xf32, #tpu.memory_space<vmem>>, vector<48x128xf32>
    tpu.vector_store %arg3[%c0_27, %c0_28], %150 {strides = array<i32>} : memref<48x128xf32, #tpu.memory_space<vmem>>, vector<48x128xf32>,
    %c0_29 = arith.constant 0 : index
    %c0_30 = arith.constant 0 : index
    %152 = vector.load %arg2[%c0_29, %c0_30] : memref<12x48xf32, #tpu.memory_space<vmem>>, vector<12x48xf32>
    %cst_31 = arith.constant dense<0.000000e+00> : vector<12x128xf32>
    %153 = tpu.matmul %152, %150, %cst_31 {dimension_numbers = #tpu.dot_dimension_numbers<[1], [0], [0], [1], [0, 0, 1, 1], [], []>} : vector<12x48xf32>, vector<48x128xf32>, vector<12x128xf32> -> vector<12x128xf32>
    %c0_32 = arith.constant 0 : index
    %c0_33 = arith.constant 0 : index
    %154 = vector.load %arg4[%c0_32, %c0_33] : memref<12x128xf32, #tpu.memory_space<vmem>>, vector<12x128xf32>
    tpu.vector_store %arg4[%c0_32, %c0_33], %153 {strides = array<i32>} : memref<12x128xf32, #tpu.memory_space<vmem>>, vector<12x128xf32>,
    return
  }
  func.func @transform_0(%arg0: i32) -> (i32, i32) {
    %c0_i32 = arith.constant 0 : i32
    %c0_i32_0 = arith.constant 0 : i32
    return %c0_i32, %arg0 : i32, i32
  }
  func.func @transform_1(%arg0: i32) -> (i32, i32) {
    %c0_i32 = arith.constant 0 : i32
    %c0_i32_0 = arith.constant 0 : i32
    %c0_i32_1 = arith.constant 0 : i32
    return %c0_i32, %c0_i32_0 : i32, i32
  }
  func.func @transform_2(%arg0: i32) -> (i32, i32) {
    %c0_i32 = arith.constant 0 : i32
    %c0_i32_0 = arith.constant 0 : i32
    return %c0_i32, %arg0 : i32, i32
  }
  func.func @transform_3(%arg0: i32) -> (i32, i32) {
    %c0_i32 = arith.constant 0 : i32
    %c0_i32_0 = arith.constant 0 : i32
    return %c0_i32, %arg0 : i32, i32
  }
}

</mosaic_0001>

<bundles_post_ra>
// kernel: tpu_custom_call.1
= control target key start
LH: loop header
LB: loop body
LE: loop exit
PB: predicated region body
PF: predicated region fallthrough
CT: control target
= control target key end

     0   :  { %9 = vsyncpa [#allocation3], 0  ;;  %s689_s0 = inlined_call_operand.hbm [shape: f32[1,128], index: 0, kind: input, shape index: {}]   ;;  %s690_s1 = inlined_call_operand.hbm [shape: f32[12,48], index: 1, kind: input, shape index: {}]   ;;  %s691_s2 = inlined_call_operand.hbm [shape: f32[48,128], index: 2, kind: output, shape index: {0}]   ;;  %s692_s3 = inlined_call_operand.hbm [shape: f32[12,128], index: 3, kind: output, shape index: {1}]  }
   0x1   :  { %10 = vsyncpa [#allocation6], 0 }
   0x2   :  { %11 = vsyncpa [#allocation4], 0 }
   0x3   :  { %12 = vsyncpa [#allocation9], 0  ;;  %s489_s12 = smov [#allocation2]   ;;  %s490_s14 = smov [#allocation5]  }
   0x4   :  { %s19_s13 = sshll.u32 %s489_s12, 4  ;;  %s28_s15 = sshll.u32 %s490_s14, 4  ;;  %s20_s13 = int_to_ptr.vmem [resolvable:$true] %s19_s13  ;;  %s515_s15 = int_to_ptr.vmem [resolvable:$true] %s28_s15 }
   0x5   :  { %s393_s18 = scalar_lea.hbm %s689_s0, 16 }
   0x6   :  { %p394_p0 = scmp.ne.s32.totalorder %s689_s0, %s393_s18  ;;  %p397_p1 = scmp.lt.u32.totalorder %s393_s18, %s689_s0 }
   0x8   :  { %p399_p2 = pnand %p397_p1, %p394_p0 }
   0xa   :  { %402 = shalt.err (!%p399_p2)
}
   0xb   :  { %s403_s23 = scalar_lea.vmem %s20_s13, 16  ;;  %s407_s24 = scalar_lea.vmem %s20_s13, 32 }
   0xc   :  { %p404_p3 = scmp.ne.s32.totalorder %s20_s13, %s403_s23  ;;  %p408_p4 = scmp.lt.s32.totalorder %s20_s13, %s20_s13 }
   0xd   :  { %p409_p5 = scmp.lt.s32.totalorder %s407_s24, %s403_s23 }
   0xf   :  { %p410_p6 = por %p409_p5, %p408_p4 }
  0x11   :  { %p411_p7 = pnand %p410_p6, %p404_p3 }
  0x13   :  { %414 = shalt.err (!%p411_p7)
}
  0x14   :  { %22 = dma.hbm_to_vmem [thread:$0]  %s689_s0, 16, %s20_s13, [#allocation3]  }
  0x15   :  { %s415_s29 = scalar_lea.hbm %s690_s1, 256 }
  0x16   :  { %p416_p8 = scmp.ne.s32.totalorder %s690_s1, %s415_s29  ;;  %p419_p9 = scmp.lt.u32.totalorder %s415_s29, %s690_s1 }
  0x18   :  { %p421_p10 = pnand %p419_p9, %p416_p8 }
  0x1a   :  { %424 = shalt.err (!%p421_p10)
}
  0x1b   :  { %s425_s7 = scalar_lea.vmem %s515_s15, 256  ;;  %p430_p12 = scmp.lt.s32.totalorder %s515_s15, %s515_s15 }
  0x1c   :  { %p426_p11 = scmp.ne.s32.totalorder %s515_s15, %s425_s7  ;;  %p431_p13 = scmp.lt.s32.totalorder %s425_s7, %s425_s7 }
  0x1e   :  { %p432_p0 = por %p431_p13, %p430_p12 }
  0x20   :  { %p433_p1 = pnand %p432_p0, %p426_p11 }
  0x22   :  { %436 = shalt.err (!%p433_p1)
}
  0x23   :  { %s491_s0 = smov 128   ;;  %s492_s8 = smov 8  }
  0x24   :  { %34 = dma.hbm_to_vmem [thread:$0]  %s690_s1, 256, %s515_s15, [#allocation6], %s491_s0, %s491_s0, %s492_s8  }
  0x25   :  { %481 = dma.done.wait [#allocation3], 16  }
  0x26   :  { %482 = vsyncadd [#allocation3], 4294967280 }
  0x27   :  { %483 = dma.done.wait [#allocation6], 256  }
  0x28   :  { %484 = vsyncadd [#allocation6], 4294967040  ;;  %vm225_vm0 = vcmask 392192   ;;  %v41_v0 = vld [vmem:[#allocation2] sm:$0x1]  ;;  %v223_v1 = vld [vmem:[#allocation5] sm:$0xff]  ;;  %v103_v5 = vlaneseq }
  0x29   :  { %v42_v2 = vmul.f32 15.0, %v41_v0  ;;  %370 = vmatprep.mubr.msk.f32.mxu0 %vm225_vm0, %v223_v1  ;;  %s493_s1 = smov [#allocation7]  }
  0x2a   :  { %v104_v8 = vshrl.u32 %v103_v5, 7  ;;  %s314_s11 = sshll.u32 %s493_s1, 4  ;;  %s315_s11 = int_to_ptr.vmem [resolvable:$true] %s314_s11 }
  0x2b   :  { %v43_v3 = vmul.f32 0.33333334, %v42_v2  ;;  %s437_s12 = scalar_lea.vmem %s315_s11, 768  ;;  %p442_p3 = scmp.lt.s32.totalorder %s315_s11, %s315_s11 }
  0x2c   :  { %v550_v12 = vsub.s32 0, %v104_v8  ;;  %v105_v15 = vadd.s32 8, %v104_v8  ;;  %p438_p2 = scmp.ne.s32.totalorder %s315_s11, %s437_s12  ;;  %p443_p4 = scmp.lt.s32.totalorder %s437_s12, %s437_s12 }
  0x2d   :  { %v44_v4 = vfloor.f32 %v43_v3 }
  0x2e   :  { %p444_p5 = por %p443_p4, %p442_p3 }
  0x2f   :  { %v45_v6 = vmax.f32 %v44_v4, 0.0 }
  0x30   :  { %p445_p6 = pnand %p444_p5, %p438_p2 }
  0x31   :  { %v46_v7 = vmin.f32 %v45_v6, 4.0 }
  0x33   :  { %v47_v9 = vmul.f32 3.0, %v46_v7 }
  0x35   :  { %v48_v10 = vsub.f32 %v42_v2, %v47_v9  ;;  %v385_v11 = vtrunc.f32 %v47_v9 }
  0x37   :  { %v49_v13 = vmul.f32 0.6666667, %v48_v10  ;;  %v386_v14 = vcvt.f32.s32 %v385_v11 }
  0x39   :  { %v343_v16 = vadd.f32 -1.0, %v49_v13  ;;  %v110_v17 = vrot.slane %v386_v14, %v550_v12 }
  0x3b   :  { %v553_v18 = vadd.f32 1.0, %v343_v16  ;;  %v555_v19 = vadd.f32 0.33333334, %v343_v16  ;;  %v557_v20 = vadd.f32 -0.33333334, %v343_v16  ;;  %v347_v21 = vadd.f32 -1.0, %v343_v16 }
  0x3c   :  { %v559_v22 = vsub.s32 %v104_v8, %v110_v17  ;;  %v561_v23 = vsub.s32 %v105_v15, %v110_v17 }
  0x3d   :  { %v55_v24 = vmul.f32 %v557_v20, %v555_v19  ;;  %v69_v25 = vmul.f32 %v557_v20, %v553_v18  ;;  %v80_v26 = vmul.f32 %v555_v19, %v553_v18  ;;  %v58_v27 = vmul.f32 %v347_v21, %v557_v20 }
  0x3e   :  { %vm113_vm1 = vcmp.eq.s32.totalorder %v559_v22, 0  ;;  %vm114_vm2 = vcmp.eq.s32.totalorder %v561_v23, 0  ;;  %vm115_vm3 = vcmp.eq.s32.totalorder %v559_v22, 1  ;;  %vm116_vm4 = vcmp.eq.s32.totalorder %v561_v23, 1 }
  0x3f   :  { %v56_v28 = vmul.f32 %v347_v21, %v55_v24  ;;  %v70_v29 = vmul.f32 %v347_v21, %v69_v25  ;;  %v81_v30 = vmul.f32 %v347_v21, %v80_v26  ;;  %v92_v31 = vmul.f32 %v557_v20, %v80_v26 }
  0x40   :  { %vm117_vm5 = vcmp.eq.s32.totalorder %v559_v22, 2  ;;  %vm118_vm6 = vcmp.eq.s32.totalorder %v561_v23, 2  ;;  %vm119_vm7 = vcmp.eq.s32.totalorder %v559_v22, 3  ;;  %vm120_vm8 = vcmp.eq.s32.totalorder %v561_v23, 3 }
  0x41   :  { %v57_v32 = vmul.f32 -0.5625, %v56_v28  ;;  %v71_v33 = vmul.f32 1.6875, %v70_v29  ;;  %v82_v34 = vmul.f32 -1.6875, %v81_v30  ;;  %v93_v35 = vmul.f32 0.5625, %v92_v31 }
  0x42   :  { %v59_v36 = vmul.f32 %v347_v21, %v555_v19  ;;  %v72_v37 = vmul.f32 %v347_v21, %v553_v18  ;;  %v94_v38 = vadd.f32 %v69_v25, %v55_v24  ;;  %v63_v39 = vadd.f32 %v347_v21, %v557_v20 }
  0x43   :  { %v125_v40 = vrot.slane %v93_v35, %v550_v12  ;;  %v133_v41 = vrot.slane %v82_v34, %v550_v12  ;;  %v141_v42 = vrot.slane %v71_v33, %v550_v12  ;;  %v149_v43 = vrot.slane %v57_v32, %v550_v12 }
  0x44   :  { %v60_v44 = vadd.f32 %v59_v36, %v58_v27  ;;  %v73_v45 = vadd.f32 %v72_v37, %v58_v27  ;;  %v83_v46 = vadd.f32 %v72_v37, %v59_v36  ;;  %v95_v47 = vadd.f32 %v94_v38, %v80_v26 }
  0x45   :  { %v127_v48 = vsel %vm119_vm7, %v125_v40, 0.0  ;;  %v128_v49 = vsel %vm120_vm8, %v125_v40, 0.0  ;;  %v64_v50 = vadd.f32 %v347_v21, %v63_v39  ;;  %v86_v51 = vadd.f32 %v347_v21, %v555_v19 }
  0x46   :  { %v135_v52 = vsel %vm117_vm5, %v133_v41, %v127_v48  ;;  %v136_v53 = vsel %vm118_vm6, %v133_v41, %v128_v49  ;;  %v61_v54 = vadd.f32 %v60_v44, %v55_v24  ;;  %v74_v55 = vadd.f32 %v73_v45, %v69_v25  ;;  %v224_v49 = vld [vmem:[#allocation5 + $0x8] sm:$0xf] }
  0x47   :  { %v143_v56 = vsel %vm115_vm3, %v141_v42, %v135_v52  ;;  %v144_v57 = vsel %vm116_vm4, %v141_v42, %v136_v53  ;;  %v84_v58 = vadd.f32 %v83_v46, %v80_v26  ;;  %v96_v59 = vmul.f32 5.625, %v95_v47 }
  0x48   :  { %v151_v60 = vsel %vm113_vm1, %v149_v43, %v143_v56  ;;  %v152_v61 = vsel %vm114_vm2, %v149_v43, %v144_v57  ;;  %v62_v62 = vmul.f32 -5.625, %v61_v54  ;;  %v75_v63 = vmul.f32 16.875, %v74_v55 }
  0x49   :  { %217 = vst [vmem:[#allocation7] sm:$0xff] %v151_v60  ;;  %218 = vst [vmem:[#allocation7 + $0x8] sm:$0xff] %v152_v61  ;;  %v373_v0 = vpack.c.bf16 %v152_v61, %v151_v60  ;;  %v85_v1 = vmul.f32 -16.875, %v84_v58  ;;  %v157_v2 = vrot.slane %v96_v59, %v550_v12  ;;  %v65_v4 = vadd.f32 %v555_v19, %v64_v50 }
  0x4a   :  { %v173_v3 = vrot.slane %v75_v63, %v550_v12  ;;  %v76_v5 = vadd.f32 %v553_v18, %v64_v50  ;;  %v87_v6 = vadd.f32 %v347_v21, %v86_v51  ;;  %v181_v10 = vrot.slane %v62_v62, %v550_v12 }
  0x4b   :  { %374 = vmatprep.subr.bf16.mxu0 %v373_v0  ;;  %v159_v7 = vsel %vm119_vm7, %v157_v2, 0.0  ;;  %v160_v8 = vsel %vm120_vm8, %v157_v2, 0.0  ;;  %v165_v9 = vrot.slane %v85_v1, %v550_v12  ;;  %v97_v13 = vadd.f32 %v557_v20, %v555_v19 }
  0x4c   :  { %376 = vmatpush3.bf16.msra.mxu0 %v373_v0  ;;  %v88_v11 = vadd.f32 %v553_v18, %v87_v6  ;;  %v77_v16 = vadd.f32 %v557_v20, %v76_v5  ;;  %v66_v24 = vadd.f32 %v557_v20, %v65_v4 }
  0x4d   :  { %v167_v14 = vsel %vm117_vm5, %v165_v9, %v159_v7  ;;  %v168_v15 = vsel %vm118_vm6, %v165_v9, %v160_v8  ;;  %v98_v28 = vadd.f32 %v557_v20, %v97_v13 }
  0x4e   :  { %v175_v17 = vsel %vm115_vm3, %v173_v3, %v167_v14  ;;  %v176_v21 = vsel %vm116_vm4, %v173_v3, %v168_v15  ;;  %v89_v25 = vadd.f32 %v555_v19, %v88_v11  ;;  %v78_v31 = vadd.f32 %v553_v18, %v77_v16 }
  0x4f   :  { %v183_v26 = vsel %vm113_vm1, %v181_v10, %v175_v17  ;;  %v184_v27 = vsel %vm114_vm2, %v181_v10, %v176_v21  ;;  %v99_v32 = vadd.f32 %v553_v18, %v98_v28  ;;  %v67_v33 = vadd.f32 %v555_v19, %v66_v24 }
  0x50   :  { %219 = vst [vmem:[#allocation7 + $0x10] sm:$0xff] %v183_v26  ;;  %220 = vst [vmem:[#allocation7 + $0x18] sm:$0xff] %v184_v27  ;;  %v377_v29 = vpack.c.bf16 %v184_v27, %v183_v26  ;;  %v90_v30 = vadd.f32 %v553_v18, %v89_v25  ;;  %v79_v36 = vmul.f32 168.75, %v78_v31 }
  0x51   :  { %v100_v34 = vadd.f32 %v555_v19, %v99_v32  ;;  %v68_v20 = vmul.f32 -56.25, %v67_v33 }
  0x52   :  { %378 = vmatprep.subr.bf16.mxu0 %v377_v29  ;;  %v91_v35 = vmul.f32 -168.75, %v90_v30  ;;  %v205_v41 = vrot.slane %v79_v36, %v550_v12 }
  0x53   :  { %380 = vmatpush3.bf16.msra.mxu0 %v377_v29  ;;  %v101_v37 = vadd.f32 %v553_v18, %v100_v34  ;;  %v213_v42 = vrot.slane %v68_v20, %v550_v12 }
  0x54   :  { %v197_v39 = vrot.slane %v91_v35, %v550_v12 }
  0x55   :  { %v102_v38 = vmul.f32 56.25, %v101_v37 }
  0x57   :  { %v189_v40 = vrot.slane %v102_v38, %v550_v12 }
  0x59   :  { %v191_v43 = vsel %vm119_vm7, %v189_v40, 0.0  ;;  %v192_v19 = vsel %vm120_vm8, %v189_v40, 0.0 }
  0x5a   :  { %v199_v44 = vsel %vm117_vm5, %v197_v39, %v191_v43  ;;  %v200_v18 = vsel %vm118_vm6, %v197_v39, %v192_v19 }
  0x5b   :  { %v207_v45 = vsel %vm115_vm3, %v205_v41, %v199_v44  ;;  %v208_v46 = vsel %vm116_vm4, %v205_v41, %v200_v18 }
  0x5c   :  { %v215_v12 = vsel %vm113_vm1, %v213_v42, %v207_v45  ;;  %v216_v47 = vsel %vm114_vm2, %v213_v42, %v208_v46 }
  0x5d   :  { %221 = vst [vmem:[#allocation7 + $0x20] sm:$0xff] %v215_v12  ;;  %222 = vst [vmem:[#allocation7 + $0x28] sm:$0xff] %v216_v47  ;;  %v381_v48 = vpack.c.bf16 %v216_v47, %v215_v12 }
  0x5f   :  { %382 = vmatprep.subr.bf16.mxu0 %v381_v48 }
  0x60   :  { %384 = vmatpush3.bf16.msra.mxu0 %v381_v48 }
  0x63   :  { %371 = vmatmul.mubr.msk.f32.vlgmr.msra.gmra.mrb[0].mxu0 %vm225_vm0, %v224_v49 }
  0x64   :  { %448 = shalt.err (!%p445_p6)
}
  0x65   :  { %s449_s15 = scalar_lea.hbm %s691_s2, 768 }
  0x66   :  { %p450_p7 = scmp.ne.s32.totalorder %s691_s2, %s449_s15  ;;  %p453_p8 = scmp.lt.u32.totalorder %s449_s15, %s691_s2 }
  0x68   :  { %p455_p9 = pnand %p453_p8, %p450_p7 }
  0x6a   :  { %458 = shalt.err (!%p455_p9)
}
  0x6b   :  { %320 = dma.vmem_to_hbm [thread:$0]  %s315_s11, 768, %s691_s2, [#allocation4], %s491_s0, %s491_s0, %s492_s8  }
  0x6c   :  { %s494_s22 = smov [#allocation8]  }
  0x6d   :  { %s326_s23 = sshll.u32 %s494_s22, 4  ;;  %s327_s23 = int_to_ptr.vmem [resolvable:$true] %s326_s23 }
  0x6e   :  { %s459_s24 = scalar_lea.vmem %s327_s23, 256  ;;  %p464_p11 = scmp.lt.s32.totalorder %s327_s23, %s327_s23 }
  0x6f   :  { %p460_p10 = scmp.ne.s32.totalorder %s327_s23, %s459_s24  ;;  %p465_p12 = scmp.lt.s32.totalorder %s459_s24, %s459_s24 }
  0x71   :  { %p466_p13 = por %p465_p12, %p464_p11 }
  0x73   :  { %p467_p0 = pnand %p466_p13, %p460_p10 }
 0x136   :  { %v372_v22 = vpop.f32.mrb[0].mxu0 }
 0x137   :  { %308 = vst [vmem:[#allocation8 + $0x8] sm:$0xf] %v372_v22  ;;  %v298_v23 = vpop.f32.mrb[1].mxu0 }
 0x138   :  { %307 = vst [vmem:[#allocation8] sm:$0xff] %v298_v23 }
 0x139   :  { %470 = shalt.err (!%p467_p0)
}
 0x13a   :  { %s471_s27 = scalar_lea.hbm %s692_s3, 256 }
 0x13b   :  { %p472_p1 = scmp.ne.s32.totalorder %s692_s3, %s471_s27  ;;  %p475_p2 = scmp.lt.u32.totalorder %s471_s27, %s692_s3 }
 0x13d   :  { %p477_p3 = pnand %p475_p2, %p472_p1 }
 0x13f   :  { %480 = shalt.err (!%p477_p3)
}
 0x140   :  { %332 = dma.vmem_to_hbm [thread:$0]  %s327_s23, 256, %s692_s3, [#allocation9], %s491_s0, %s491_s0, %s492_s8  }
 0x141   :  { %485 = dma.done.wait [#allocation4], 768  }
 0x142   :  { %486 = vsyncadd [#allocation4], 4294966528 }
 0x143   :  { %487 = dma.done.wait [#allocation9], 256  }
 0x144   :  { %488 = vsyncadd [#allocation9], 4294967040 }
 0x145   :  { %339 = vsyncpa [#allocation3], 1 }
 0x146   :  { %340 = vsyncpa [#allocation6], 1 }
 0x147   :  { %341 = vsyncpa [#allocation4], 1 }
 0x148   :  { %342 = vsyncpa [#allocation9], 1 }

</bundles_post_ra>
